<compile_context>
chip_gen: v5e
topology: v5e:2x2
jax: 0.10.0
libtpu: 0.0.40
codegen_flags: <defaults>
</compile_context>

<pallas_src>
import functools

import jax
import jax.numpy as jnp
from jax.experimental import pallas as pl
from jax.experimental.pallas import tpu as pltpu


def _cdiv(a, b):
    return -(-a // b)


def _round_up(a, b):
    return _cdiv(a, b) * b


def _chip_budget():
    """Per-generation budgets: (vmem_limit_bytes, tiling_budget_bytes, gate_dtype)."""
    kind = ""
    try:
        kind = jax.devices()[0].device_kind.lower()
    except Exception:
        pass
    if "v7" in kind:
        # 64 MiB physical VMEM per TC: leave compiler headroom.
        return 56 << 20, 44 << 20, jnp.bfloat16
    if "v6" in kind:
        # 128 MiB physical: allow big hidden tiles (th~2048 at D=4096).
        return 104 << 20, 92 << 20, jnp.bfloat16
    if "v5" in kind:
        # 128 MiB physical, but no bf16 VPU/EUP -> keep SiLU gate in f32.
        return 100 << 20, 88 << 20, jnp.float32
    # Unknown chip / interpret mode: conservative.
    return 64 << 20, 48 << 20, jnp.float32


def _choose_hidden_tile(H, D, tm, vmem_budget, out_itemsize=4, max_th=2048):
    """Largest 128-aligned hidden tile whose double-buffered weight blocks fit VMEM.

    Per hidden-tile step the weight VMEM cost is ~12*th*D bytes
    (w13 block (D,2th) bf16 x2 buffers + w2t block (th,D) bf16 x2 buffers).
    """
    # Activation-side VMEM: x tile (bf16, x2 buffers) + out tile (x2) + f32 acc.
    act_bytes = 2 * (tm * D * 2) + 2 * (tm * D * out_itemsize) + tm * D * 4
    weight_budget = max(vmem_budget - act_bytes, 12 * D * 128)
    th_cap = max(128, min(max_th, (weight_budget // (12 * D)) // 128 * 128))
    h128 = _round_up(H, 128)
    if h128 <= th_cap:
        return h128
    # Split into the fewest tiles that respect th_cap, then even them out
    # (minimizes zero-padding of the hidden dim, e.g. H=11008 -> th=1408, pad 256).
    nh = _cdiv(h128, th_cap)
    th = _round_up(_cdiv(H, nh), 128)
    return th


def prepare_ffn_weights(w1, w2, w3, *, th=None, tm=256, dtype=jnp.bfloat16,
                        out_itemsize=4):
    """One-time weight prep (call at load time, outside the hot path).

    w1, w3: (H, D) PyTorch nn.Linear(dim->hidden) weights.
    w2    : (D, H) PyTorch nn.Linear(hidden->dim) weight.
    Returns (w13, w2t, th):
      w13: (D, 2*Hp) bf16, per-hidden-tile [w1t_tile | w3t_tile] layout,
           hidden dim zero-padded to Hp = round_up(H, th).
      w2t: (Hp, D) bf16, zero-padded rows.  Padded hidden units contribute 0.
    """
    H, D = w1.shape
    if th is None:
        _, budget, _ = _chip_budget()
        th = _choose_hidden_tile(H, D, tm, budget, out_itemsize=out_itemsize)
    Hp = _round_up(H, th)
    nh = Hp // th

    w1t = w1.T.astype(dtype)                      # (D, H)
    w3t = w3.T.astype(dtype)                      # (D, H)
    w2t = w2.T.astype(dtype)                      # (H, D)
    if Hp != H:
        pad = Hp - H
        w1t = jnp.pad(w1t, ((0, 0), (0, pad)))
        w3t = jnp.pad(w3t, ((0, 0), (0, pad)))
        w2t = jnp.pad(w2t, ((0, pad), (0, 0)))

    # tile j -> w13 columns [2*th*j, 2*th*(j+1)) = [w1_tile_j | w3_tile_j]
    w13 = jnp.concatenate(
        [w1t.reshape(D, nh, th), w3t.reshape(D, nh, th)], axis=2
    ).reshape(D, 2 * Hp)
    return w13, w2t, th


def _ffn_kernel(x_ref, w13_ref, w2_ref, o_ref, acc_ref, *, gate_dtype):
    # x_ref  : (tm, D)     bf16 token tile
    # w13_ref: (D, 2*th)   bf16 fused [w1t_tile | w3t_tile] for hidden tile j
    # w2_ref : (th, D)     bf16 w2 transposed, hidden tile j
    # o_ref  : (tm, D)     output (resident across j)
    # acc_ref: (tm, D)     f32 accumulator scratch
    j = pl.program_id(1)

    x = x_ref[...]
    # Single wide MXU matmul for both w1 and w3 projections of this hidden tile.
    h = jnp.dot(x, w13_ref[...], preferred_element_type=jnp.float32)   # (tm, 2*th)
    th = h.shape[1] // 2
    h1 = h[:, :th].astype(gate_dtype)
    h3 = h[:, th:].astype(gate_dtype)
    gated = (h1 * jax.nn.sigmoid(h1)) * h3                             # SiLU(h1)*h3
    part = jnp.dot(gated.astype(w2_ref.dtype), w2_ref[...],
                   preferred_element_type=jnp.float32)                 # (tm, D)

    @pl.when(j == 0)
    def _():
        acc_ref[...] = part          # direct write: no zero-init pass + add

    @pl.when(j > 0)
    def _():
        acc_ref[...] += part

    @pl.when(j == pl.num_programs(1) - 1)
    def _():
        o_ref[...] = acc_ref[...].astype(o_ref.dtype)


def feed_forward(x, w13, w2t, th, *, tm=256, out_dtype=None):
    """x: (M, D) activations. w13/w2t/th from prepare_ffn_weights. Returns (M, D)."""
    M, D = x.shape
    Hp = w2t.shape[0]
    assert w13.shape == (D, 2 * Hp) and Hp % th == 0

    vmem_limit, _, gate_dtype = _chip_budget()
    if out_dtype is None:
        out_dtype = x.dtype
    out_itemsize = jnp.dtype(out_dtype).itemsize

    xb = x.astype(jnp.bfloat16)

    # Shrink the token tile for small M (decode) instead of padding to tm.
    tm_eff = min(tm, _round_up(M, 8))
    m_pad = _round_up(M, tm_eff)
    if m_pad != M:
        xb = jnp.pad(xb, ((0, m_pad - M), (0, 0)))

    n_tok = m_pad // tm_eff
    n_hid = Hp // th
    grid = (n_tok, n_hid)

    # Optional deeper weight buffering only for small tiles with enough steps.
    w_kwargs = {}
    buffered = getattr(pl, "Buffered", None)
    if buffered is not None and th <= 512 and n_hid >= 3:
        w_kwargs = dict(pipeline_mode=buffered(3))

    cost = pl.CostEstimate(
        flops=6 * m_pad * Hp * D,
        transcendentals=m_pad * Hp,
        bytes_accessed=(n_tok * 6 * Hp * D          # bf16 weights re-streamed per token tile
                        + m_pad * D * 2             # x read (bf16)
                        + m_pad * D * out_itemsize  # output write
                        ),
    )

    out = pl.pallas_call(
        functools.partial(_ffn_kernel, gate_dtype=gate_dtype),
        out_shape=jax.ShapeDtypeStruct((m_pad, D), out_dtype),
        grid_spec=pltpu.PrefetchScalarGridSpec(
            num_scalar_prefetch=0,
            grid=grid,
            in_specs=[
                pl.BlockSpec((tm_eff, D), lambda i, j: (i, 0)),              # x tile
                pl.BlockSpec((D, 2 * th), lambda i, j: (0, j), **w_kwargs),  # w1|w3 tile
                pl.BlockSpec((th, D), lambda i, j: (j, 0), **w_kwargs),      # w2t tile
            ],
            out_specs=pl.BlockSpec((tm_eff, D), lambda i, j: (i, 0)),
            scratch_shapes=[pltpu.VMEM((tm_eff, D), jnp.float32)],
        ),
        compiler_params=pltpu.CompilerParams(
            dimension_semantics=("parallel", "arbitrary"),
            vmem_limit_bytes=vmem_limit,
        ),
        cost_estimate=cost,
    )(xb, w13, w2t)

    return out[:M] if m_pad != M else out


if __name__ == "__main__":
    # Small shapes consistent with the module: dim=128, hidden=256,
    # batch=2, seq=8 -> 16 tokens (not a multiple of tm; exercises tile shrink).
    batch, seq, dim, hidden = 2, 8, 128, 256

    key = jax.random.PRNGKey(0)
    kx, k1, k2, k3 = jax.random.split(key, 4)
    x = jax.random.normal(kx, (batch, seq, dim), dtype=jnp.float32)
    # nn.Linear(dim, hidden).weight shape = (hidden, dim), etc.
    w1 = jax.random.normal(k1, (hidden, dim), dtype=jnp.float32) * 0.02
    w2 = jax.random.normal(k2, (dim, hidden), dtype=jnp.float32) * 0.02
    w3 = jax.random.normal(k3, (hidden, dim), dtype=jnp.float32) * 0.02

    # One-time weight prep (transpose + w1/w3 fusion + hidden pad + bf16 cast).
    w13, w2t, th = prepare_ffn_weights(w1, w2, w3)

    x2d = x.reshape(batch * seq, dim)
    out = feed_forward(x2d, w13, w2t, th)
    out = jax.block_until_ready(out).reshape(batch, seq, dim)

    # Pure-JAX f32 reference (PyTorch FeedForward semantics).
    h1 = x @ w1.T
    ref = (h1 * jax.nn.sigmoid(h1) * (x @ w3.T)) @ w2.T
    # bf16 matmuls inside the kernel -> loosened tolerance vs f32 reference.
    assert jnp.allclose(out, ref, atol=5e-3, rtol=5e-2), "mismatch vs reference"

    print("KERNEL_OK")
</pallas_src>

<mosaic_0001>
module attributes {stable_mosaic.version = 11 : i64} {
  func.func @_ffn_kernel(%arg0: i32, %arg1: i32, %arg2: memref<16x128xbf16, #tpu.memory_space<vmem>>, %arg3: memref<128x512xbf16, #tpu.memory_space<vmem>>, %arg4: memref<256x128xbf16, #tpu.memory_space<vmem>>, %arg5: memref<16x128xf32, #tpu.memory_space<vmem>>, %arg6: memref<16x128xf32, #tpu.memory_space<vmem>>) attributes {dimension_semantics = [#tpu.dimension_semantics<parallel>, #tpu.dimension_semantics<arbitrary>], iteration_bounds = array<i64: 1, 1>, scalar_prefetch = 0 : i64, scratch_operands = 1 : i64, tpu.core_type = #tpu.core_type<tc>, window_params = [{transform_indices = @transform_0, window_bounds = array<i64: 16, 128>}, {transform_indices = @transform_1, window_bounds = array<i64: 128, 512>}, {transform_indices = @transform_2, window_bounds = array<i64: 256, 128>}, {transform_indices = @transform_3, window_bounds = array<i64: 16, 128>}]} {
    %c0 = arith.constant 0 : index
    %c0_0 = arith.constant 0 : index
    %0 = vector.load %arg2[%c0, %c0_0] : memref<16x128xbf16, #tpu.memory_space<vmem>>, vector<16x128xbf16>
    %c0_1 = arith.constant 0 : index
    %c0_2 = arith.constant 0 : index
    %1 = vector.load %arg3[%c0_1, %c0_2] : memref<128x512xbf16, #tpu.memory_space<vmem>>, vector<128x512xbf16>
    %cst = arith.constant dense<0.000000e+00> : vector<16x512xf32>
    %2 = tpu.matmul %0, %1, %cst {dimension_numbers = #tpu.dot_dimension_numbers<[1], [0], [0], [1], [0, 0, 1, 1], [], []>} : vector<16x128xbf16>, vector<128x512xbf16>, vector<16x512xf32> -> vector<16x512xf32>
    %3 = vector.extract_strided_slice %2 {offsets = [0, 0], sizes = [16, 256], strides = [1, 1]} : vector<16x512xf32> to vector<16x256xf32>
    %4 = vector.extract_strided_slice %2 {offsets = [0, 256], sizes = [16, 256], strides = [1, 1]} : vector<16x512xf32> to vector<16x256xf32>
    %5 = arith.negf %3 : vector<16x256xf32>
    %6 = math.exp %5 : vector<16x256xf32>
    %cst_3 = arith.constant 1.000000e+00 : f32
    %7 = vector.broadcast %cst_3 : f32 to vector<16x256xf32>
    %8 = arith.addf %7, %6 : vector<16x256xf32>
    %9 = arith.divf %7, %8 : vector<16x256xf32>
    %10 = arith.mulf %3, %9 : vector<16x256xf32>
    %11 = arith.mulf %10, %4 : vector<16x256xf32>
    %12 = arith.truncf %11 : vector<16x256xf32> to vector<16x256xbf16>
    %c0_4 = arith.constant 0 : index
    %c0_5 = arith.constant 0 : index
    %13 = vector.load %arg4[%c0_4, %c0_5] : memref<256x128xbf16, #tpu.memory_space<vmem>>, vector<256x128xbf16>
    %cst_6 = arith.constant dense<0.000000e+00> : vector<16x128xf32>
    %14 = tpu.matmul %12, %13, %cst_6 {dimension_numbers = #tpu.dot_dimension_numbers<[1], [0], [0], [1], [0, 0, 1, 1], [], []>} : vector<16x256xbf16>, vector<256x128xbf16>, vector<16x128xf32> -> vector<16x128xf32>
    %c0_i32 = arith.constant 0 : i32
    %15 = arith.cmpi eq, %arg1, %c0_i32 : i32
    %16 = arith.extui %15 : i1 to i32
    %c0_i32_7 = arith.constant 0 : i32
    %17 = arith.cmpi ne, %16, %c0_i32_7 : i32
    scf.if %17 {
      %c0_12 = arith.constant 0 : index
      %c0_13 = arith.constant 0 : index
      %24 = vector.load %arg6[%c0_12, %c0_13] : memref<16x128xf32, #tpu.memory_space<vmem>>, vector<16x128xf32>
      tpu.vector_store %arg6[%c0_12, %c0_13], %14 {strides = array<i32>} : memref<16x128xf32, #tpu.memory_space<vmem>>, vector<16x128xf32>,
    } else {
    }
    %c0_i32_8 = arith.constant 0 : i32
    %18 = arith.cmpi sgt, %arg1, %c0_i32_8 : i32
    %19 = arith.extui %18 : i1 to i32
    %c0_i32_9 = arith.constant 0 : i32
    %20 = arith.cmpi ne, %19, %c0_i32_9 : i32
    scf.if %20 {
      %c0_12 = arith.constant 0 : index
      %c0_13 = arith.constant 0 : index
      %24 = vector.load %arg6[%c0_12, %c0_13] : memref<16x128xf32, #tpu.memory_space<vmem>>, vector<16x128xf32>
      %25 = arith.addf %24, %14 : vector<16x128xf32>
      %c0_14 = arith.constant 0 : index
      %c0_15 = arith.constant 0 : index
      %26 = vector.load %arg6[%c0_14, %c0_15] : memref<16x128xf32, #tpu.memory_space<vmem>>, vector<16x128xf32>
      tpu.vector_store %arg6[%c0_14, %c0_15], %25 {strides = array<i32>} : memref<16x128xf32, #tpu.memory_space<vmem>>, vector<16x128xf32>,
    } else {
    }
    %c0_i32_10 = arith.constant 0 : i32
    %21 = arith.cmpi eq, %arg1, %c0_i32_10 : i32
    %22 = arith.extui %21 : i1 to i32
    %c0_i32_11 = arith.constant 0 : i32
    %23 = arith.cmpi ne, %22, %c0_i32_11 : i32
    scf.if %23 {
      %c0_12 = arith.constant 0 : index
      %c0_13 = arith.constant 0 : index
      %24 = vector.load %arg6[%c0_12, %c0_13] : memref<16x128xf32, #tpu.memory_space<vmem>>, vector<16x128xf32>
      %c0_14 = arith.constant 0 : index
      %c0_15 = arith.constant 0 : index
      %25 = vector.load %arg5[%c0_14, %c0_15] : memref<16x128xf32, #tpu.memory_space<vmem>>, vector<16x128xf32>
      tpu.vector_store %arg5[%c0_14, %c0_15], %24 {strides = array<i32>} : memref<16x128xf32, #tpu.memory_space<vmem>>, vector<16x128xf32>,
    } else {
    }
    return
  }
  func.func @transform_0(%arg0: i32, %arg1: i32) -> (i32, i32) {
    %c0_i32 = arith.constant 0 : i32
    %c0_i32_0 = arith.constant 0 : i32
    return %arg0, %c0_i32 : i32, i32
  }
  func.func @transform_1(%arg0: i32, %arg1: i32) -> (i32, i32) {
    %c0_i32 = arith.constant 0 : i32
    %c0_i32_0 = arith.constant 0 : i32
    return %c0_i32, %arg1 : i32, i32
  }
  func.func @transform_2(%arg0: i32, %arg1: i32) -> (i32, i32) {
    %c0_i32 = arith.constant 0 : i32
    %c0_i32_0 = arith.constant 0 : i32
    return %arg1, %c0_i32 : i32, i32
  }
  func.func @transform_3(%arg0: i32, %arg1: i32) -> (i32, i32) {
    %c0_i32 = arith.constant 0 : i32
    %c0_i32_0 = arith.constant 0 : i32
    return %arg0, %c0_i32 : i32, i32
  }
}

</mosaic_0001>

<bundles_post_ra>
// kernel: tpu_custom_call.1
= control target key start
LH: loop header
LB: loop body
LE: loop exit
PB: predicated region body
PF: predicated region fallthrough
CT: control target
= control target key end

     0   :  { %8 = vsyncpa [#allocation4], 0  ;;  %s1050_s0 = inlined_call_operand.hbm [shape: bf16[16,128], index: 0, kind: input, shape index: {}]   ;;  %s1051_s1 = inlined_call_operand.hbm [shape: bf16[128,512], index: 1, kind: input, shape index: {}]   ;;  %s1052_s2 = inlined_call_operand.hbm [shape: bf16[256,128], index: 2, kind: input, shape index: {}]   ;;  %s1053_s3 = inlined_call_operand.hbm [shape: f32[16,128], index: 3, kind: output, shape index: {}]  }
   0x1   :  { %9 = vsyncpa [#allocation7], 0  ;;  %s28_s14 = sshll.u32 %s1051_s1, 4  ;;  %s29_s14 = int_to_ptr.hbm [resolvable:$true] %s28_s14 }
   0x2   :  { %10 = vsyncpa [#allocation5], 0  ;;  %s980_s15 = smov [#allocation6]   ;;  %s15_s19 = sshll.u32 %s1050_s0, 4  ;;  %s16_s19 = int_to_ptr.hbm [resolvable:$true] %s15_s19 }
   0x3   :  { %s30_s16 = sshll.u32 %s980_s15, 4  ;;  %s981_s20 = smov 256   ;;  %s31_s16 = int_to_ptr.vmem [resolvable:$true] %s30_s16 }
   0x4   :  { %s982_s21 = smov 16   ;;  %s983_s22 = smov [#allocation3]  }
   0x5   :  { %36 = dma.hbm_to_vmem [thread:$0]  %s29_s14, 4096, %s31_s16, [#allocation7], %s981_s20, %s981_s20, %s982_s21  }
   0x6   :  { %s17_s23 = sshll.u32 %s983_s22, 4  ;;  %s984_s24 = smov 64   ;;  %s18_s23 = int_to_ptr.vmem [resolvable:$true] %s17_s23 }
   0x7   :  { %s985_s25 = smov 4   ;;  %s41_s27 = sshll.u32 %s1052_s2, 4  ;;  %s42_s27 = int_to_ptr.hbm [resolvable:$true] %s41_s27 }
   0x8   :  { %23 = dma.hbm_to_vmem [thread:$0]  %s16_s19, 128, %s18_s23, [#allocation4], %s984_s24, %s984_s24, %s985_s25  }
   0x9   :  { %s986_s28 = smov [#allocation8]  }
   0xa   :  { %s43_s29 = sshll.u32 %s986_s28, 4  ;;  %s44_s29 = int_to_ptr.vmem [resolvable:$true] %s43_s29 }
   0xb   :  { %49 = dma.hbm_to_vmem [thread:$0]  %s42_s27, 2048, %s44_s29, [#allocation7], %s984_s24, %s984_s24, %s985_s25  }
   0xc   :  { %974 = dma.done.wait [#allocation4], 128  }
   0xd   :  { %975 = vsyncadd [#allocation4], 4294967168 }
   0xe   :  { %976 = dma.done.wait [#allocation7], 6144  }
   0xf   :  { %977 = vsyncadd [#allocation7], 4294961152  ;;  %v721_v0 = vld [vmem:[#allocation6 + $0xe0] sm:$0xf]  ;;  %v834_v1 = vld [vmem:[#allocation6 + $0xec] sm:$0xf0] }
  0x10   :  { %v832_v2 = vld [vmem:[#allocation6 + $0xe4] sm:$0xf]  ;;  %v722_v3 = vor.u32 %v834_v1, %v721_v0  ;;  %v723_v4 = vld [vmem:[#allocation6 + $0xf0] sm:$0xf0]  ;;  %v705_v5 = vld [vmem:[#allocation6 + $0xc0] sm:$0xf] }
  0x11   :  { %v830_v6 = vld [vmem:[#allocation6 + $0xcc] sm:$0xf0]  ;;  %v726_v7 = vor.u32 %v832_v2, %v723_v4  ;;  %v828_v8 = vld [vmem:[#allocation6 + $0xc4] sm:$0xf]  ;;  %v707_v9 = vld [vmem:[#allocation6 + $0xd0] sm:$0xf0] }
  0x12   :  { %262 = vmatpush.bf16.msra.mxu0 %v722_v3  ;;  %v706_v10 = vor.u32 %v830_v6, %v705_v5  ;;  %v710_v11 = vor.u32 %v828_v8, %v707_v9  ;;  %v689_v12 = vld [vmem:[#allocation6 + $0xa0] sm:$0xf]  ;;  %v826_v13 = vld [vmem:[#allocation6 + $0xac] sm:$0xf0]  ;;  %v824_v14 = vld [vmem:[#allocation6 + $0xa4] sm:$0xf] }
  0x13   :  { %276 = vmatpush.bf16.msra.mxu1 %v726_v7  ;;  %v691_v15 = vld [vmem:[#allocation6 + $0xb0] sm:$0xf0]  ;;  %v729_v16 = vld [vmem:[#allocation6 + $0xe8] sm:$0xf]  ;;  %v690_v17 = vor.u32 %v826_v13, %v689_v12  ;;  %v835_v18 = vld [vmem:[#allocation6 + $0xf4] sm:$0xf0] }
  0x14   :  { %v833_v19 = vld [vmem:[#allocation6 + $0xec] sm:$0xf]  ;;  %v731_v20 = vld [vmem:[#allocation6 + $0xf8] sm:$0xf0]  ;;  %v694_v21 = vor.u32 %v824_v14, %v691_v15  ;;  %v673_v22 = vld [vmem:[#allocation6 + $0x80] sm:$0xf]  ;;  %v730_v25 = vor.u32 %v835_v18, %v729_v16 }
  0x15   :  { %v822_v23 = vld [vmem:[#allocation6 + $0x8c] sm:$0xf0]  ;;  %v820_v24 = vld [vmem:[#allocation6 + $0x84] sm:$0xf]  ;;  %v734_v26 = vor.u32 %v833_v19, %v731_v20  ;;  %v675_v27 = vld [vmem:[#allocation6 + $0x90] sm:$0xf0] }
  0x16   :  { %263 = vmatpush.bf16.msra.mxu0 %v706_v10  ;;  %v713_v28 = vld [vmem:[#allocation6 + $0xc8] sm:$0xf]  ;;  %v831_v29 = vld [vmem:[#allocation6 + $0xd4] sm:$0xf0]  ;;  %290 = vmatpush.bf16.msra.mxu2 %v730_v25  ;;  %v829_v31 = vld [vmem:[#allocation6 + $0xcc] sm:$0xf]  ;;  %v674_v33 = vor.u32 %v822_v23, %v673_v22  ;;  %v678_v37 = vor.u32 %v820_v24, %v675_v27 }
  0x17   :  { %277 = vmatpush.bf16.msra.mxu1 %v710_v11  ;;  %304 = vmatpush.bf16.msra.mxu3 %v734_v26  ;;  %v714_v30 = vor.u32 %v831_v29, %v713_v28  ;;  %v715_v32 = vld [vmem:[#allocation6 + $0xd8] sm:$0xf0]  ;;  %v657_v34 = vld [vmem:[#allocation6 + $0x60] sm:$0xf]  ;;  %v818_v35 = vld [vmem:[#allocation6 + $0x6c] sm:$0xf0] }
  0x18   :  { %v718_v36 = vor.u32 %v829_v31, %v715_v32  ;;  %v697_v38 = vld [vmem:[#allocation6 + $0xa8] sm:$0xf]  ;;  %v827_v39 = vld [vmem:[#allocation6 + $0xb4] sm:$0xf0]  ;;  %v825_v40 = vld [vmem:[#allocation6 + $0xac] sm:$0xf]  ;;  %v658_v47 = vor.u32 %v818_v35, %v657_v34 }
  0x19   :  { %v816_v41 = vld [vmem:[#allocation6 + $0x64] sm:$0xf]  ;;  %v659_v42 = vld [vmem:[#allocation6 + $0x70] sm:$0xf0]  ;;  %v699_v43 = vld [vmem:[#allocation6 + $0xb8] sm:$0xf0]  ;;  %v698_v44 = vor.u32 %v827_v39, %v697_v38 }
  0x1a   :  { %264 = vmatpush.bf16.msra.mxu0 %v690_v17  ;;  %291 = vmatpush.bf16.msra.mxu2 %v714_v30  ;;  %v702_v45 = vor.u32 %v825_v40, %v699_v43  ;;  %v681_v46 = vld [vmem:[#allocation6 + $0x88] sm:$0xf]  ;;  %v823_v48 = vld [vmem:[#allocation6 + $0x94] sm:$0xf0]  ;;  %v821_v49 = vld [vmem:[#allocation6 + $0x8c] sm:$0xf]  ;;  %v662_v51 = vor.u32 %v816_v41, %v659_v42 }
  0x1b   :  { %278 = vmatpush.bf16.msra.mxu1 %v694_v21  ;;  %305 = vmatpush.bf16.msra.mxu3 %v718_v36  ;;  %v683_v50 = vld [vmem:[#allocation6 + $0x98] sm:$0xf0]  ;;  %v641_v52 = vld [vmem:[#allocation6 + $0x40] sm:$0xf]  ;;  %v814_v53 = vld [vmem:[#allocation6 + $0x4c] sm:$0xf0]  ;;  %v682_v56 = vor.u32 %v823_v48, %v681_v46 }
  0x1c   :  { %v812_v54 = vld [vmem:[#allocation6 + $0x44] sm:$0xf]  ;;  %v643_v55 = vld [vmem:[#allocation6 + $0x50] sm:$0xf0]  ;;  %v686_v57 = vor.u32 %v821_v49, %v683_v50  ;;  %v665_v58 = vld [vmem:[#allocation6 + $0x68] sm:$0xf]  ;;  %v642_v59 = vor.u32 %v814_v53, %v641_v52 }
  0x1d   :  { %v819_v60 = vld [vmem:[#allocation6 + $0x74] sm:$0xf0]  ;;  %v817_v61 = vld [vmem:[#allocation6 + $0x6c] sm:$0xf]  ;;  %v667_v62 = vld [vmem:[#allocation6 + $0x78] sm:$0xf0]  ;;  %v646_v63 = vor.u32 %v812_v54, %v643_v55 }
  0x1e   :  { %265 = vmatpush.bf16.msra.mxu0 %v674_v33  ;;  %292 = vmatpush.bf16.msra.mxu2 %v698_v44  ;;  %v625_v0 = vld [vmem:[#allocation6 + $0x20] sm:$0xf]  ;;  %v810_v1 = vld [vmem:[#allocation6 + $0x2c] sm:$0xf0]  ;;  %v808_v2 = vld [vmem:[#allocation6 + $0x24] sm:$0xf]  ;;  %v666_v4 = vor.u32 %v819_v60, %v665_v58  ;;  %v670_v5 = vor.u32 %v817_v61, %v667_v62 }
  0x1f   :  { %279 = vmatpush.bf16.msra.mxu1 %v678_v37  ;;  %306 = vmatpush.bf16.msra.mxu3 %v702_v45  ;;  %v627_v3 = vld [vmem:[#allocation6 + $0x30] sm:$0xf0]  ;;  %v649_v6 = vld [vmem:[#allocation6 + $0x48] sm:$0xf]  ;;  %v626_v7 = vor.u32 %v810_v1, %v625_v0  ;;  %v815_v8 = vld [vmem:[#allocation6 + $0x54] sm:$0xf0] }
  0x20   :  { %v813_v9 = vld [vmem:[#allocation6 + $0x4c] sm:$0xf]  ;;  %v651_v10 = vld [vmem:[#allocation6 + $0x58] sm:$0xf0]  ;;  %v630_v11 = vor.u32 %v808_v2, %v627_v3  ;;  %v609_v12 = vld [vmem:[#allocation6] sm:$0xf]  ;;  %v650_v16 = vor.u32 %v815_v8, %v649_v6 }
  0x21   :  { %v806_v13 = vld [vmem:[#allocation6 + $0xc] sm:$0xf0]  ;;  %v804_v14 = vld [vmem:[#allocation6 + $0x4] sm:$0xf]  ;;  %v611_v15 = vld [vmem:[#allocation6 + $0x10] sm:$0xf0]  ;;  %v654_v17 = vor.u32 %v813_v9, %v651_v10 }
  0x22   :  { %266 = vmatpush.bf16.msra.mxu0 %v658_v47  ;;  %293 = vmatpush.bf16.msra.mxu2 %v682_v56  ;;  %v610_v18 = vor.u32 %v806_v13, %v609_v12  ;;  %v633_v19 = vld [vmem:[#allocation6 + $0x28] sm:$0xf]  ;;  %v811_v20 = vld [vmem:[#allocation6 + $0x34] sm:$0xf0]  ;;  %v614_v21 = vor.u32 %v804_v14, %v611_v15  ;;  %v809_v22 = vld [vmem:[#allocation6 + $0x2c] sm:$0xf] }
  0x23   :  { %280 = vmatpush.bf16.msra.mxu1 %v662_v51  ;;  %307 = vmatpush.bf16.msra.mxu3 %v686_v57  ;;  %v635_v23 = vld [vmem:[#allocation6 + $0x38] sm:$0xf0]  ;;  %v634_v25 = vor.u32 %v811_v20, %v633_v19  ;;  %v617_v27 = vld [vmem:[#allocation6 + $0x8] sm:$0xf]  ;;  %v807_v28 = vld [vmem:[#allocation6 + $0x14] sm:$0xf0] }
  0x24   :  { %v803_v24 = vld [vmem:[#allocation3] sm:$0xff]  ;;  %v638_v26 = vor.u32 %v809_v22, %v635_v23  ;;  %v805_v29 = vld [vmem:[#allocation6 + $0xc] sm:$0xf]  ;;  %v618_v31 = vor.u32 %v807_v28, %v617_v27  ;;  %v842_v35 = vld [vmem:[#allocation8 + $0x30] sm:$0xff]  ;;  %s987_s0 = smov [#allocation9]   ;;  %s589_s5 = sshll.u32 %s1053_s3, 4  ;;  %s590_s5 = int_to_ptr.hbm [resolvable:$true] %s589_s5 }
  0x25   :  { %v619_v30 = vld [vmem:[#allocation6 + $0x18] sm:$0xf0]  ;;  %v850_v36 = vld [vmem:[#allocation8 + $0x70] sm:$0xff]  ;;  %v841_v37 = vld [vmem:[#allocation8 + $0x28] sm:$0xff]  ;;  %s587_s2 = sshll.u32 %s987_s0, 4  ;;  %s988_s6 = smov 128   ;;  %s588_s2 = int_to_ptr.vmem [resolvable:$true] %s587_s2 }
  0x26   :  { %267 = vmatpush.bf16.msra.mxu0 %v642_v59  ;;  %294 = vmatpush.bf16.msra.mxu2 %v666_v4  ;;  %v622_v32 = vor.u32 %v805_v29, %v619_v30  ;;  %v843_v33 = vld [vmem:[#allocation8 + $0x38] sm:$0xff]  ;;  %v849_v38 = vld [vmem:[#allocation8 + $0x68] sm:$0xff]  ;;  %v840_v39 = vld [vmem:[#allocation8 + $0x20] sm:$0xff]  ;;  %s989_s7 = smov 8  }
  0x27   :  { %281 = vmatpush.bf16.msra.mxu1 %v646_v63  ;;  %308 = vmatpush.bf16.msra.mxu3 %v670_v5  ;;  %v851_v34 = vld [vmem:[#allocation8 + $0x78] sm:$0xff]  ;;  %v848_v40 = vld [vmem:[#allocation8 + $0x60] sm:$0xff]  ;;  %v838_v47 = vld [vmem:[#allocation8 + $0x10] sm:$0xff] }
  0x28   :  { %v839_v41 = vld [vmem:[#allocation8 + $0x18] sm:$0xff]  ;;  %v846_v48 = vld [vmem:[#allocation8 + $0x50] sm:$0xff]  ;;  %v837_v49 = vld [vmem:[#allocation8 + $0x8] sm:$0xff] }
  0x29   :  { %v847_v42 = vld [vmem:[#allocation8 + $0x58] sm:$0xff]  ;;  %v845_v50 = vld [vmem:[#allocation8 + $0x48] sm:$0xff]  ;;  %v836_v58 = vld [vmem:[#allocation8] sm:$0xff] }
  0x2a   :  { %268 = vmatpush.bf16.msra.mxu0 %v626_v7  ;;  %295 = vmatpush.bf16.msra.mxu2 %v650_v16  ;;  %v844_v59 = vld [vmem:[#allocation8 + $0x40] sm:$0xff] }
  0x2b   :  { %282 = vmatpush.bf16.msra.mxu1 %v630_v11  ;;  %309 = vmatpush.bf16.msra.mxu3 %v654_v17 }
  0x2e   :  { %269 = vmatpush.bf16.msra.mxu0 %v610_v18  ;;  %296 = vmatpush.bf16.msra.mxu2 %v634_v25 }
  0x2f   :  { %283 = vmatpush.bf16.msra.mxu1 %v614_v21  ;;  %310 = vmatpush.bf16.msra.mxu3 %v638_v26 }
  0x31   :  { %270 = vmatmul.bf16.vlgmr.msra.gmra.mxu0 %v803_v24 }
  0x32   :  { %284 = vmatmul.bf16.vlgmr.msra.gmra.mxu1 %v803_v24  ;;  %297 = vmatpush.bf16.msra.mxu2 %v618_v31 }
  0x33   :  { %311 = vmatpush.bf16.msra.mxu3 %v622_v32  ;;  %532 = vmatpush.bf16.msrb.mxu0 %v843_v33 }
  0x34   :  { %546 = vmatpush.bf16.msrb.mxu1 %v851_v34 }
  0x35   :  { %298 = vmatmul.bf16.vlgmr.msra.gmra.mxu2 %v803_v24 }
  0x36   :  { %312 = vmatmul.bf16.vlgmr.msra.gmra.mxu3 %v803_v24 }
  0x37   :  { %533 = vmatpush.bf16.msrb.mxu0 %v842_v35 }
  0x38   :  { %547 = vmatpush.bf16.msrb.mxu1 %v850_v36 }
  0x3b   :  { %534 = vmatpush.bf16.msrb.mxu0 %v841_v37 }
  0x3c   :  { %548 = vmatpush.bf16.msrb.mxu1 %v849_v38 }
  0x3f   :  { %535 = vmatpush.bf16.msrb.mxu0 %v840_v39 }
  0x40   :  { %549 = vmatpush.bf16.msrb.mxu1 %v848_v40 }
  0x43   :  { %536 = vmatpush.bf16.msrb.mxu0 %v839_v41 }
  0x44   :  { %550 = vmatpush.bf16.msrb.mxu1 %v847_v42 }
  0x47   :  { %537 = vmatpush.bf16.msrb.mxu0 %v838_v47 }
  0x48   :  { %551 = vmatpush.bf16.msrb.mxu1 %v846_v48 }
  0x4b   :  { %538 = vmatpush.bf16.msrb.mxu0 %v837_v49 }
  0x4c   :  { %552 = vmatpush.bf16.msrb.mxu1 %v845_v50 }
  0x4f   :  { %539 = vmatpush.bf16.msrb.mxu0 %v836_v58 }
  0x50   :  { %553 = vmatpush.bf16.msrb.mxu1 %v844_v59 }
  0xae   :  { %v1019_v43 = vpop.f32.mrf.mxu0 }
  0xaf   :  { %v735_v44 = vmul.f32 -1.442695, %v1019_v43  ;;  %v1022_v45 = vpop.f32.mrf.mxu1 }
  0xb0   :  { %v736_v46 = vmul.f32 -1.442695, %v1022_v45 }
  0xb1   :  { %862 = vpow2.f32 %v735_v44 }
  0xb2   :  { %864 = vpow2.f32 %v736_v46 }
  0xb6   :  { %v1025_v51 = vpop.f32.mrf.mxu0 }
  0xb7   :  { %v863_v52 = vpop.eup %862  ;;  %v737_v53 = vmul.f32 -1.442695, %v1025_v51  ;;  %v1028_v54 = vpop.f32.mrf.mxu1 }
  0xb8   :  { %v865_v55 = vpop.eup %864  ;;  %v330_v56 = vadd.f32 1.0, %v863_v52  ;;  %v738_v57 = vmul.f32 -1.442695, %v1028_v54  ;;  %v299_v17 = vpop.f32.mrf.mxu2 }
  0xb9   :  { %v331_v60 = vadd.f32 1.0, %v865_v55  ;;  %866 = vpow2.f32 %v737_v53  ;;  %v313_v28 = vpop.f32.mrf.mxu3 }
  0xba   :  { %868 = vrcp.f32 %v330_v56  ;;  %v345_v11 = vand.u32 2147483648, %v330_v56  ;;  %vm339_vm1 = vweird.f32 %v330_v56  ;;  %v343_v12 = vand.u32 2147483647, %v330_v56 }
  0xbb   :  { %870 = vrcp.f32 %v331_v60  ;;  %v358_v16 = vand.u32 2147483647, %v331_v60  ;;  %v360_v20 = vand.u32 2147483648, %v331_v60  ;;  %vm354_vm4 = vweird.f32 %v331_v60 }
  0xbc   :  { %872 = vpow2.f32 %v738_v57  ;;  %v346_v22 = vor.u32 1.1754944e-38, %v345_v11  ;;  %vm344_vm5 = vcmp.eq.f32.partialorder %v343_v12, 8.507059e+37 }
  0xbd   :  { %vm359_vm8 = vcmp.eq.f32.partialorder %v358_v16, 8.507059e+37  ;;  %v361_v32 = vor.u32 1.1754944e-38, %v360_v20 }
  0xbf   :  { %v867_v61 = vpop.eup %866 }
  0xc0   :  { %v869_v62 = vpop.eup %868  ;;  %v332_v63 = vadd.f32 1.0, %v867_v61  ;;  %v301_v49 = vpop.f32.mrf.mxu2 }
  0xc1   :  { %v871_v0 = vpop.eup %870  ;;  %v335_v1 = vmul.f32 %v869_v62, %v330_v56  ;;  %vm340_vm0 = vweird.f32 %v869_v62  ;;  %v315_v56 = vpop.f32.mrf.mxu3 }
  0xc2   :  { %v873_v2 = vpop.eup %872  ;;  %v350_v3 = vmul.f32 %v871_v0, %v331_v60  ;;  %874 = vrcp.f32 %v332_v63  ;;  %vm1031_vm2 = vmor %vm339_vm1, %vm340_vm0  ;;  %vm355_vm3 = vweird.f32 %v871_v0  ;;  %v375_v23 = vand.u32 2147483648, %v332_v63 }
  0xc3   :  { %v336_v4 = vsub.f32 1.0, %v335_v1  ;;  %v333_v5 = vadd.f32 1.0, %v873_v2  ;;  %vm1037_vm6 = vmor %vm354_vm4, %vm355_vm3  ;;  %v373_v27 = vand.u32 2147483647, %v332_v63  ;;  %vm369_vm9 = vweird.f32 %v332_v63 }
  0xc4   :  { %v351_v6 = vsub.f32 1.0, %v350_v3  ;;  %v376_v35 = vor.u32 1.1754944e-38, %v375_v23 }
  0xc5   :  { %v337_v7 = vmul.f32 %v869_v62, %v336_v4  ;;  %876 = vrcp.f32 %v333_v5  ;;  %v390_v34 = vand.u32 2147483648, %v333_v5  ;;  %v388_v37 = vand.u32 2147483647, %v333_v5 }
  0xc6   :  { %v352_v8 = vmul.f32 %v871_v0, %v351_v6  ;;  %vm374_vm12 = vcmp.eq.f32.partialorder %v373_v27, 8.507059e+37  ;;  %vm384_vm13 = vweird.f32 %v333_v5 }
  0xc7   :  { %v338_v9 = vadd.f32 %v869_v62, %v337_v7  ;;  %v391_v46 = vor.u32 1.1754944e-38, %v390_v34  ;;  %vm389_vm15 = vcmp.eq.f32.partialorder %v388_v37, 8.507059e+37 }
  0xc8   :  { %v875_v10 = vpop.eup %874  ;;  %v353_v15 = vadd.f32 %v871_v0, %v352_v8 }
  0xc9   :  { %v365_v13 = vmul.f32 %v875_v10, %v332_v63  ;;  %v342_v19 = vsel %vm1031_vm2, %v869_v62, %v338_v9  ;;  %vm370_vm7 = vweird.f32 %v875_v10 }
  0xca   :  { %v347_v29 = vsel %vm344_vm5, %v346_v22, %v342_v19  ;;  %v357_v30 = vsel %vm1037_vm6, %v871_v0, %v353_v15  ;;  %vm371_vm10 = vmor %vm369_vm9, %vm370_vm7 }
  0xcb   :  { %v877_v18 = vpop.eup %876  ;;  %v366_v21 = vsub.f32 1.0, %v365_v13  ;;  %v394_v38 = vmul.f32 %v347_v29, %v1019_v43  ;;  %v362_v39 = vsel %vm359_vm8, %v361_v32, %v357_v30 }
  0xcc   :  { %v380_v24 = vmul.f32 %v877_v18, %v333_v5  ;;  %vm385_vm11 = vweird.f32 %v877_v18  ;;  %v395_v47 = vmul.f32 %v362_v39, %v1022_v45 }
  0xcd   :  { %v367_v26 = vmul.f32 %v875_v10, %v366_v21  ;;  %vm386_vm14 = vmor %vm384_vm13, %vm385_vm11  ;;  %v398_v52 = vmul.f32 %v394_v38, %v299_v17 }
  0xce   :  { %v381_v31 = vsub.f32 1.0, %v380_v24  ;;  %v399_v57 = vmul.f32 %v395_v47, %v313_v28 }
  0xcf   :  { %v368_v33 = vadd.f32 %v875_v10, %v367_v26 }
  0xd0   :  { %v382_v36 = vmul.f32 %v877_v18, %v381_v31 }
  0xd1   :  { %v372_v40 = vsel %vm371_vm10, %v875_v10, %v368_v33 }
  0xd2   :  { %v377_v41 = vsel %vm374_vm12, %v376_v35, %v372_v40  ;;  %v383_v42 = vadd.f32 %v877_v18, %v382_v36 }
  0xd3   :  { %v396_v44 = vmul.f32 %v377_v41, %v1025_v51 }
  0xd4   :  { %v387_v48 = vsel %vm386_vm14, %v877_v18, %v383_v42 }
  0xd5   :  { %v392_v50 = vsel %vm389_vm15, %v391_v46, %v387_v48  ;;  %v400_v53 = vmul.f32 %v396_v44, %v301_v49 }
  0xd6   :  { %v397_v43 = vmul.f32 %v392_v50, %v1028_v54 }
  0xd7   :  { %v402_v55 = vpack.c.bf16 %v400_v53, %v398_v52 }
  0xd8   :  { %v401_v58 = vmul.f32 %v397_v43, %v315_v56 }
  0xd9   :  { %540 = vmatmul.bf16.vlgmr.msrb.gmra.mxu0 %v402_v55 }
  0xda   :  { %v403_v59 = vpack.c.bf16 %v401_v58, %v399_v57 }
  0xdc   :  { %554 = vmatmul.bf16.vlgmr.msrb.gmra.mxu1 %v403_v59 }
 0x156   :  { %v541_v51 = vpop.f32.mrf.mxu0 }
 0x159   :  { %v555_v60 = vpop.f32.mrf.mxu1 }
 0x15a   :  { %v556_v61 = vadd.f32 %v555_v60, %v541_v51 }
 0x15c   :  { %581 = vst [vmem:[#allocation9] sm:$0xff] %v556_v61 }
 0x15e   :  { %v543_v45 = vpop.f32.mrf.mxu0 }
 0x161   :  { %v557_v62 = vpop.f32.mrf.mxu1 }
 0x162   :  { %v558_v54 = vadd.f32 %v557_v62, %v543_v45 }
 0x164   :  { %582 = vst [vmem:[#allocation9 + $0x8] sm:$0xff] %v558_v54 }
 0x165   :  { %595 = dma.vmem_to_hbm [thread:$0]  %s588_s2, 256, %s590_s5, [#allocation5], %s988_s6, %s988_s6, %s989_s7  }
 0x166   :  { %978 = dma.done.wait [#allocation5], 256  }
 0x167   :  { %979 = vsyncadd [#allocation5], 4294967040 }
 0x168   :  { %600 = vsyncpa [#allocation4], 1 }
 0x169   :  { %601 = vsyncpa [#allocation7], 1 }
 0x16a   :  { %602 = vsyncpa [#allocation5], 1 }

</bundles_post_ra>
